<compile_context>
chip_gen: v7x
topology: tpu7x:2x2x1
jax: 0.10.0
libtpu: 0.0.40
codegen_flags: <defaults>
</compile_context>

<pallas_src>
import jax
import jax.numpy as jnp
from jax.experimental import pallas as pl
from jax.experimental.pallas import tpu as pltpu


def _round_up(v: int, m: int) -> int:
    return (v + m - 1) // m * m


def _sublane(dtype) -> int:
    # Sublane packing: 8 rows for 4-byte, 16 for 2-byte, 32 for 1-byte dtypes.
    return max(8, 8 * (4 // jnp.dtype(dtype).itemsize))


def _vmem_limit_bytes(est_bytes: int) -> int:
    try:
        cap = int(pltpu.get_tpu_info().vmem_capacity_bytes)
    except Exception:
        cap = 64 * 1024 * 1024  # conservative: v7x per-TensorCore VMEM
    return int(min(max(2 * est_bytes, 4 * 1024 * 1024), int(0.7 * cap)))


# ---------------------------------------------------------------------------
# Kernels
# ---------------------------------------------------------------------------

def _decode_single_k(x_ref, w_ref, b_ref, o_ref):
    # Whole K in one tile: no accumulator, no pl.when, single unmasked store.
    o_ref[...] = (
        jnp.dot(x_ref[...], w_ref[...], preferred_element_type=jnp.float32)
        + b_ref[...]
    ).astype(o_ref.dtype)


def _decode_multi_k_f32out(x_ref, w_ref, b_ref, o_ref):
    # Multi-K, f32 output: accumulate directly into the resident output block
    # (output BlockSpec returns the same block index for every k).
    k = pl.program_id(2)

    @pl.when(k == 0)
    def _init():
        o_ref[...] = jnp.broadcast_to(b_ref[...], o_ref.shape)

    o_ref[...] += jnp.dot(
        x_ref[...], w_ref[...], preferred_element_type=jnp.float32
    )


def _decode_multi_k(x_ref, w_ref, b_ref, o_ref, acc_ref):
    # Multi-K, non-f32 output: f32 VMEM scratch accumulator + finalize cast.
    k = pl.program_id(2)

    @pl.when(k == 0)
    def _init():
        acc_ref[...] = jnp.zeros_like(acc_ref)

    acc_ref[...] += jnp.dot(
        x_ref[...], w_ref[...], preferred_element_type=jnp.float32
    )

    @pl.when(k == pl.num_programs(2) - 1)
    def _finalize():
        o_ref[...] = (acc_ref[...] + b_ref[...]).astype(o_ref.dtype)


# ---------------------------------------------------------------------------
# Wrapper
# ---------------------------------------------------------------------------

def prepare_decoder_params(w, b, *, compute_dtype=jnp.bfloat16,
                           tn=1024, tk=1024):
    """Cast + pad W/b ONCE (amortized over all forward calls)."""
    latent, out_dim = w.shape
    assert b.shape == (out_dim,)
    compute_dtype = jnp.dtype(compute_dtype)

    tn = min(tn, _round_up(out_dim, 128))
    tk = min(tk, _round_up(latent, 128))
    Np = _round_up(out_dim, tn)
    # v7x has two TensorCores; ensure >= 2 blocks along the N ("parallel")
    # axis when out_dim is large enough, so small-batch decodes shard across
    # both cores (neutral on single-TC v5e/v6e).
    if Np >= 256 and Np // tn < 2:
        tn = max(128, (Np // 2) // 128 * 128)
        Np = _round_up(out_dim, tn)
    Kp = _round_up(latent, tk)

    wp = w.astype(compute_dtype)
    if (Kp, Np) != (latent, out_dim):
        wp = jnp.pad(wp, ((0, Kp - latent), (0, Np - out_dim)))
    bp = b.astype(jnp.float32)
    if Np != out_dim:
        bp = jnp.pad(bp, (0, Np - out_dim))
    bp = bp.reshape(1, Np)

    return dict(w=wp, b=bp, out_dim=out_dim, latent_dim=latent,
                tn=tn, tk=tk, compute_dtype=compute_dtype)


def decoder_forward(x, params, *, tm=256, out_dtype=None):
    """y = x @ W + b with pre-prepared (cast + padded) params."""
    batch, latent = x.shape
    assert latent == params["latent_dim"]

    w, bvec = params["w"], params["b"]
    tn, tk = params["tn"], params["tk"]
    compute_dtype = params["compute_dtype"]
    out_dim = params["out_dim"]
    Kp, Np = w.shape

    out_dtype = jnp.dtype(out_dtype or x.dtype)

    # tm aligned to the dtype sublane packing (8 f32 / 16 bf16 / 32 int8).
    tm = min(tm, _round_up(batch, _sublane(compute_dtype)))
    Mp = _round_up(batch, tm)

    xp = x if x.dtype == compute_dtype else x.astype(compute_dtype)
    if (Mp, Kp) != (batch, latent):
        xp = jnp.pad(xp, ((0, Mp - batch), (0, Kp - latent)))

    grid = (Mp // tm, Np // tn, Kp // tk)
    grid_k = grid[2]

    if grid_k == 1:
        kernel, scratch = _decode_single_k, []
    elif out_dtype == jnp.dtype(jnp.float32):
        kernel, scratch = _decode_multi_k_f32out, []
    else:
        kernel = _decode_multi_k
        scratch = [pltpu.VMEM((tm, tn), jnp.float32)]

    itm = compute_dtype.itemsize
    o_bytes = out_dtype.itemsize
    # Double-buffered x/W/bias/out tiles (+ f32 scratch if used).
    vmem_est = (2 * (tm * tk * itm + tk * tn * itm + tn * 4 + tm * tn * o_bytes)
                + (tm * tn * 4 if scratch else 0))
    vmem_limit = _vmem_limit_bytes(vmem_est)

    cost = pl.CostEstimate(
        flops=2 * Mp * Np * Kp,
        transcendentals=0,
        bytes_accessed=(Mp * Kp * itm * grid[1]      # x re-read per N block
                        + Kp * Np * itm              # W streamed once
                        + Np * 4 + Mp * Np * o_bytes),
    )

    yp = pl.pallas_call(
        kernel,
        out_shape=jax.ShapeDtypeStruct((Mp, Np), out_dtype),
        grid_spec=pltpu.PrefetchScalarGridSpec(
            num_scalar_prefetch=0,
            grid=grid,
            in_specs=[
                pl.BlockSpec((tm, tk), lambda i, j, k: (i, k)),
                pl.BlockSpec((tk, tn), lambda i, j, k: (k, j)),
                pl.BlockSpec((1, tn), lambda i, j, k: (0, j)),
            ],
            out_specs=pl.BlockSpec((tm, tn), lambda i, j, k: (i, j)),
            scratch_shapes=scratch,
        ),
        compiler_params=pltpu.CompilerParams(
            dimension_semantics=("parallel", "parallel", "arbitrary"),
            vmem_limit_bytes=vmem_limit,
        ),
        cost_estimate=cost,
    )(xp, w, bvec)

    if (Mp, Np) != (batch, out_dim):
        yp = yp[:batch, :out_dim]
    return yp


class PallasDecoder:
    """Affine decoder y = x @ W + b; W/b cast+padded exactly once at init."""

    def __init__(self, out_dim, latent_dim, *, key,
                 compute_dtype=jnp.bfloat16, tn=1024, tk=1024):
        self.out_dim, self.latent_dim = out_dim, latent_dim
        kw, kb = jax.random.split(key)
        self.w_f32 = jax.random.normal(
            kw, (latent_dim, out_dim), jnp.float32) * 0.05
        self.b_f32 = jax.random.normal(kb, (out_dim,), jnp.float32) * 0.01
        self.params = prepare_decoder_params(
            self.w_f32, self.b_f32, compute_dtype=compute_dtype, tn=tn, tk=tk)

    def __call__(self, x, **kwargs):
        return decoder_forward(x, self.params, **kwargs)

    def get_params_num(self) -> int:
        return self.latent_dim * self.out_dim + self.out_dim


if __name__ == "__main__":
    batch, latent_dim, out_dim = 8, 32, 64
    key = jax.random.PRNGKey(0)
    kx, kparams, kx2 = jax.random.split(key, 3)

    x = jax.random.normal(kx, (batch, latent_dim), dtype=jnp.float32)

    # Default bf16 MXU path (f32 accumulation), single-K fast path.
    dec = PallasDecoder(out_dim, latent_dim, key=kparams)
    y = jax.block_until_ready(dec(x))
    ref_bf16 = (x.astype(jnp.bfloat16).astype(jnp.float32)
                @ dec.w_f32.astype(jnp.bfloat16).astype(jnp.float32)
                + dec.b_f32)
    assert y.shape == (batch, out_dim)
    assert jnp.allclose(y, ref_bf16, atol=1e-2, rtol=1e-2)
    assert dec.get_params_num() == latent_dim * out_dim + out_dim

    # Full-f32 path (tight tolerance).
    dec_f32 = PallasDecoder(out_dim, latent_dim, key=kparams,
                            compute_dtype=jnp.float32)
    y_f32 = jax.block_until_ready(dec_f32(x))
    assert jnp.allclose(y_f32, x @ dec_f32.w_f32 + dec_f32.b_f32,
                        atol=1e-5, rtol=1e-5)

    # Multi-K-step paths (small tiles on purpose to exercise the K loop).
    b2, l2, o2 = 10, 512, 300
    x2 = jax.random.normal(kx2, (b2, l2), dtype=jnp.float32)
    dec2 = PallasDecoder(o2, l2, key=kparams, tn=128, tk=128)
    ref2 = (x2.astype(jnp.bfloat16).astype(jnp.float32)
            @ dec2.w_f32.astype(jnp.bfloat16).astype(jnp.float32)
            + dec2.b_f32)
    # f32 output -> accumulate directly into the resident output block.
    y2 = jax.block_until_ready(dec2(x2))
    assert y2.shape == (b2, o2)
    assert jnp.allclose(y2, ref2, atol=2e-2, rtol=2e-2)
    # bf16 output -> scratch-accumulator variant.
    y2b = jax.block_until_ready(dec2(x2, out_dtype=jnp.bfloat16))
    assert jnp.allclose(y2b.astype(jnp.float32), ref2, atol=5e-2, rtol=5e-2)

    print("KERNEL_OK")
</pallas_src>

<mosaic_0001>
module attributes {stable_mosaic.version = 11 : i64} {
  func.func @_decode_single_k(%arg0: i32, %arg1: i32, %arg2: i32, %arg3: memref<16x128xbf16, #tpu.memory_space<vmem>>, %arg4: memref<128x128xbf16, #tpu.memory_space<vmem>>, %arg5: memref<1x128xf32, #tpu.memory_space<vmem>>, %arg6: memref<16x128xf32, #tpu.memory_space<vmem>>) attributes {dimension_semantics = [#tpu.dimension_semantics<parallel>, #tpu.dimension_semantics<parallel>, #tpu.dimension_semantics<arbitrary>], iteration_bounds = array<i64: 1, 1, 1>, scalar_prefetch = 0 : i64, scratch_operands = 0 : i64, tpu.core_type = #tpu.core_type<tc>, window_params = [{transform_indices = @transform_0, window_bounds = array<i64: 16, 128>}, {transform_indices = @transform_1, window_bounds = array<i64: 128, 128>}, {transform_indices = @transform_2, window_bounds = array<i64: 1, 128>}, {transform_indices = @transform_3, window_bounds = array<i64: 16, 128>}]} {
    %c0 = arith.constant 0 : index
    %c0_0 = arith.constant 0 : index
    %0 = vector.load %arg3[%c0, %c0_0] : memref<16x128xbf16, #tpu.memory_space<vmem>>, vector<16x128xbf16>
    %c0_1 = arith.constant 0 : index
    %c0_2 = arith.constant 0 : index
    %1 = vector.load %arg4[%c0_1, %c0_2] : memref<128x128xbf16, #tpu.memory_space<vmem>>, vector<128x128xbf16>
    %cst = arith.constant dense<0.000000e+00> : vector<16x128xf32>
    %2 = tpu.matmul %0, %1, %cst {dimension_numbers = #tpu.dot_dimension_numbers<[1], [0], [0], [1], [0, 0, 1, 1], [], []>} : vector<16x128xbf16>, vector<128x128xbf16>, vector<16x128xf32> -> vector<16x128xf32>
    %c0_3 = arith.constant 0 : index
    %c0_4 = arith.constant 0 : index
    %3 = vector.load %arg5[%c0_3, %c0_4] : memref<1x128xf32, #tpu.memory_space<vmem>>, vector<1x128xf32>
    %4 = vector.broadcast %3 : vector<1x128xf32> to vector<16x128xf32>
    %5 = arith.addf %2, %4 : vector<16x128xf32>
    %c0_5 = arith.constant 0 : index
    %c0_6 = arith.constant 0 : index
    %6 = vector.load %arg6[%c0_5, %c0_6] : memref<16x128xf32, #tpu.memory_space<vmem>>, vector<16x128xf32>
    tpu.vector_store %arg6[%c0_5, %c0_6], %5 {strides = array<i32>} : memref<16x128xf32, #tpu.memory_space<vmem>>, vector<16x128xf32>,
    return
  }
  func.func @transform_0(%arg0: i32, %arg1: i32, %arg2: i32) -> (i32, i32) {
    %c0_i32 = arith.constant 0 : i32
    return %arg0, %arg2 : i32, i32
  }
  func.func @transform_1(%arg0: i32, %arg1: i32, %arg2: i32) -> (i32, i32) {
    %c0_i32 = arith.constant 0 : i32
    return %arg2, %arg1 : i32, i32
  }
  func.func @transform_2(%arg0: i32, %arg1: i32, %arg2: i32) -> (i32, i32) {
    %c0_i32 = arith.constant 0 : i32
    %c0_i32_0 = arith.constant 0 : i32
    return %c0_i32, %arg1 : i32, i32
  }
  func.func @transform_3(%arg0: i32, %arg1: i32, %arg2: i32) -> (i32, i32) {
    %c0_i32 = arith.constant 0 : i32
    return %arg0, %arg1 : i32, i32
  }
}

</mosaic_0001>

<bundles_post_ra>
// kernel: tpu_custom_call.1
= control target key start
LH: loop header
LB: loop body
LE: loop exit
PB: predicated region body
PF: predicated region fallthrough
CT: control target
= control target key end

     0   :  { %8 = vsyncpa [#allocation3], 0  ;;  %s381_s0 = inlined_call_operand.hbm [shape: bf16[16,128], index: 0, kind: input, shape index: {}]   ;;  %s382_s1 = inlined_call_operand.hbm [shape: bf16[128,128], index: 1, kind: input, shape index: {}]   ;;  %s383_s2 = inlined_call_operand.vmem [shape: f32[1,128], index: 2, kind: input, shape index: {}]   ;;  %s384_s3 = inlined_call_operand.hbm [shape: f32[16,128], index: 3, kind: output, shape index: {}]  }
   0x1   :  { %9 = vsyncpa [#allocation6], 0 }
   0x2   :  { %10 = vsyncpa [#allocation4], 0  ;;  %s313_s12 = smov [#allocation2]   ;;  %s241_s16 = scalar_lea.hbm %s381_s0, 128 }
   0x3   :  { %s16_s13 = sshll.u32 %s313_s12, 4  ;;  %p242_p0 = scmp.ne.s32.totalorder %s381_s0, %s241_s16  ;;  %s17_s13 = int_to_ptr.vmem [resolvable:$true] %s16_s13 }
   0x4   :  { %p245_p1 = scmp.lt.u32.totalorder %s241_s16, %s381_s0 }
   0x6   :  { %p247_p2 = pnand %p245_p1, %p242_p0 }
   0x8   :  { %250 = shalt.err (!%p247_p2)
}
   0x9   :  { %s251_s21 = scalar_lea.vmem %s17_s13, 128  ;;  %p256_p4 = scmp.lt.s32.totalorder %s17_s13, %s17_s13 }
   0xa   :  { %p252_p3 = scmp.ne.s32.totalorder %s17_s13, %s251_s21  ;;  %p257_p5 = scmp.lt.s32.totalorder %s251_s21, %s251_s21 }
   0xc   :  { %p258_p6 = por %p257_p5, %p256_p4 }
   0xe   :  { %p259_p7 = pnand %p258_p6, %p252_p3 }
  0x10   :  { %262 = shalt.err (!%p259_p7)
}
  0x11   :  { %s314_s22 = smov 64   ;;  %s315_s23 = smov 4  }
  0x12   :  { %22 = dma.hbm_to_vmem [thread:$0]  %s381_s0, 128, %s17_s13, [#allocation3], %s314_s22, %s314_s22, %s315_s23  }
  0x13   :  { %s316_s26 = smov [#allocation5]   ;;  %s263_s30 = scalar_lea.hbm %s382_s1, 1024 }
  0x14   :  { %s28_s27 = sshll.u32 %s316_s26, 4  ;;  %p264_p8 = scmp.ne.s32.totalorder %s382_s1, %s263_s30  ;;  %s29_s27 = int_to_ptr.vmem [resolvable:$true] %s28_s27 }
  0x15   :  { %p267_p9 = scmp.lt.u32.totalorder %s263_s30, %s382_s1 }
  0x17   :  { %p269_p10 = pnand %p267_p9, %p264_p8 }
  0x19   :  { %272 = shalt.err (!%p269_p10)
}
  0x1a   :  { %s273_s8 = scalar_lea.vmem %s29_s27, 1024  ;;  %p278_p12 = scmp.lt.s32.totalorder %s29_s27, %s29_s27 }
  0x1b   :  { %p274_p11 = scmp.ne.s32.totalorder %s29_s27, %s273_s8  ;;  %p279_p13 = scmp.lt.s32.totalorder %s273_s8, %s273_s8 }
  0x1d   :  { %p280_p0 = por %p279_p13, %p278_p12 }
  0x1f   :  { %p281_p1 = pnand %p280_p0, %p274_p11 }
  0x21   :  { %284 = shalt.err (!%p281_p1)
}
  0x22   :  { %34 = dma.hbm_to_vmem [thread:$0]  %s382_s1, 1024, %s29_s27, [#allocation6], %s314_s22, %s314_s22, %s315_s23  }
  0x23   :  { %307 = dma.done.wait [#allocation3], 128  }
  0x24   :  { %308 = vsyncadd [#allocation3], 4294967168 }
  0x25   :  { %309 = dma.done.wait [#allocation6], 1024  }
  0x26   :  { %310 = vsyncadd [#allocation6], 4294966272  ;;  %v317_v0 = vmov 0.0   ;;  %vm318_vm0 = vmmov 0   ;;  %v232_v1 = vld [vmem:[#allocation5] sm:$0xff]   ;;  %v233_v2 = vld [vmem:[#allocation5 + $0x8] sm:$0xff]  }
  0x27   :  { %203 = vmatprep.subr.bf16.mxu0 %v317_v0  ;;  %219 = vmatprep.mubr.msk.bf16.mxu0 %vm318_vm0, %v317_v0  ;;  %v234_v3 = vld [vmem:[#allocation5 + $0x10] sm:$0xff]   ;;  %v235_v4 = vld [vmem:[#allocation5 + $0x18] sm:$0xff]   ;;  %v236_v5 = vld [vmem:[#allocation5 + $0x20] sm:$0xff]   ;;  %s319_s11 = smov [#allocation7]  }
  0x28   :  { %204 = vmatpush3.bf16.msra.mxu0 %v232_v1  ;;  %v237_v6 = vld [vmem:[#allocation5 + $0x28] sm:$0xff]   ;;  %v238_v7 = vld [vmem:[#allocation5 + $0x30] sm:$0xff]   ;;  %v239_v8 = vld [vmem:[#allocation5 + $0x38] sm:$0xff]   ;;  %s171_s12 = sshll.u32 %s319_s11, 4  ;;  %s172_s12 = int_to_ptr.vmem [resolvable:$true] %s171_s12 }
  0x29   :  { %205 = vmatprep.subr.bf16.mxu0 %v317_v0  ;;  %v240_v9 = vld [vmem:[#allocation2] sm:$0xff]   ;;  %s285_s13 = scalar_lea.vmem %s172_s12, 256  ;;  %p290_p3 = scmp.lt.s32.totalorder %s172_s12, %s172_s12 }
  0x2a   :  { %v184_v10 = vld [vmem:[%s383_s2] ss:$0 sm:$0xff]  ;;  %p286_p2 = scmp.ne.s32.totalorder %s172_s12, %s285_s13  ;;  %p291_p4 = scmp.lt.s32.totalorder %s285_s13, %s285_s13 }
  0x2c   :  { %206 = vmatpush3.bf16.msra.mxu0 %v233_v2  ;;  %p292_p5 = por %p291_p4, %p290_p3 }
  0x2d   :  { %207 = vmatprep.subr.bf16.mxu0 %v317_v0 }
  0x2e   :  { %p293_p6 = pnand %p292_p5, %p286_p2 }
  0x30   :  { %208 = vmatpush3.bf16.msra.mxu0 %v234_v3 }
  0x31   :  { %209 = vmatprep.subr.bf16.mxu0 %v317_v0 }
  0x34   :  { %210 = vmatpush3.bf16.msra.mxu0 %v235_v4 }
  0x35   :  { %211 = vmatprep.subr.bf16.mxu0 %v317_v0 }
  0x38   :  { %212 = vmatpush3.bf16.msra.mxu0 %v236_v5 }
  0x39   :  { %213 = vmatprep.subr.bf16.mxu0 %v317_v0 }
  0x3c   :  { %214 = vmatpush3.bf16.msra.mxu0 %v237_v6 }
  0x3d   :  { %215 = vmatprep.subr.bf16.mxu0 %v317_v0 }
  0x40   :  { %216 = vmatpush3.bf16.msra.mxu0 %v238_v7 }
  0x41   :  { %217 = vmatprep.subr.bf16.mxu0 %v317_v0 }
  0x44   :  { %218 = vmatpush3.bf16.msra.mxu0 %v239_v8 }
  0x47   :  { %220 = vmatmul.mubr.bf16.vlgmr.msra.gmra.mrb[0].mxu0 %v240_v9 }
 0x11a   :  { %v157_v11 = vpop.f32.mrb[0].mxu0 }
 0x11b   :  { %v158_v12 = vadd.f32 %v184_v10, %v157_v11  ;;  %v221_v13 = vpop.f32.mrb[1].mxu0 }
 0x11c   :  { %v160_v14 = vpop.f32.mrb[2].mxu0 }
 0x11d   :  { %164 = vst [vmem:[#allocation7] sm:$0xff] %v158_v12  ;;  %v161_v15 = vadd.f32 %v184_v10, %v160_v14  ;;  %v222_v16 = vpop.f32.mrb[3].mxu0 }
 0x11f   :  { %165 = vst [vmem:[#allocation7 + $0x8] sm:$0xff] %v161_v15 }
 0x120   :  { %296 = shalt.err (!%p293_p6)
}
 0x121   :  { %s297_s15 = scalar_lea.hbm %s384_s3, 256 }
 0x122   :  { %p298_p7 = scmp.ne.s32.totalorder %s384_s3, %s297_s15  ;;  %p301_p8 = scmp.lt.u32.totalorder %s297_s15, %s384_s3 }
 0x124   :  { %p303_p9 = pnand %p301_p8, %p298_p7 }
 0x126   :  { %306 = shalt.err (!%p303_p9)
}
 0x127   :  { %s320_s20 = smov 128   ;;  %s321_s21 = smov 8  }
 0x128   :  { %177 = dma.vmem_to_hbm [thread:$0]  %s172_s12, 256, %s384_s3, [#allocation4], %s320_s20, %s320_s20, %s321_s21  }
 0x129   :  { %311 = dma.done.wait [#allocation4], 256  }
 0x12a   :  { %312 = vsyncadd [#allocation4], 4294967040 }
 0x12b   :  { %181 = vsyncpa [#allocation3], 1 }
 0x12c   :  { %182 = vsyncpa [#allocation6], 1 }
 0x12d   :  { %183 = vsyncpa [#allocation4], 1 }

</bundles_post_ra>
